<compile_context>
chip_gen: v7x
topology: tpu7x:2x2x1
jax: 0.10.0
libtpu: 0.0.40
codegen_flags: <defaults>
</compile_context>

<pallas_src>
import jax
import jax.numpy as jnp
from jax.experimental import pallas as pl
from jax.experimental.pallas import tpu as pltpu

LANE = 128  # TPU lane width; pad all feature dims to a multiple of this.


def _round_up(n, m):
    return (n + m - 1) // m * m


def mlp_kernel(x_ref, w1_ref, b1_ref, w2_ref, b2_ref,
               w3_ref, b3_ref, w4_ref, b4_ref, o_ref):
    # Layer 1 + ReLU   (bf16 MXU matmul, f32 accumulate, f32 VPU epilogue)
    h = jnp.dot(x_ref[...], w1_ref[...], preferred_element_type=jnp.float32)
    h = jnp.maximum(h + b1_ref[...], 0.0)
    # Layer 2 + ReLU
    h = jnp.dot(h.astype(w2_ref.dtype), w2_ref[...],
                preferred_element_type=jnp.float32)
    h = jnp.maximum(h + b2_ref[...], 0.0)
    # Layer 3 + dropout (eval: identity) + ReLU
    h = jnp.dot(h.astype(w3_ref.dtype), w3_ref[...],
                preferred_element_type=jnp.float32)
    h = jnp.maximum(h + b3_ref[...], 0.0)
    # Layer 4 (no activation) — output is lane-dense (oupt padded to 128).
    out = jnp.dot(h.astype(w4_ref.dtype), w4_ref[...],
                  preferred_element_type=jnp.float32)
    o_ref[...] = (out + b4_ref[...]).astype(o_ref.dtype)


def prepare_params(params, dtype=jnp.bfloat16):
    """One-time (outside-kernel) zero-padding of feature dims to 128 and bf16
    cast of weights. Biases stay f32 (bias add / ReLU run in f32 on the VPU)."""
    def pad_w(w):
        i, o = w.shape
        wp = jnp.zeros((_round_up(i, LANE), _round_up(o, LANE)), dtype)
        return wp.at[:i, :o].set(w.astype(dtype))

    def pad_b(b):
        o = b.shape[-1]
        bp = jnp.zeros((1, _round_up(o, LANE)), jnp.float32)
        return bp.at[:, :o].set(b.reshape(1, -1).astype(jnp.float32))

    return dict(
        w1=pad_w(params["w1"]), b1=pad_b(params["b1"]),
        w2=pad_w(params["w2"]), b2=pad_b(params["b2"]),
        w3=pad_w(params["w3"]), b3=pad_b(params["b3"]),
        w4=pad_w(params["w4"]), b4=pad_b(params["b4"]),
    )


def neural_net_forward(x, params, *, tb=None):
    """x: (B, inpt) float32. params: dict of (in,out) weights and (1,out) biases
    (weights transposed vs. PyTorch so every layer is `h @ W + b`)."""
    B, inpt = x.shape
    oupt = params["w4"].shape[1]

    pp = prepare_params(params)
    inpt_p, hidn_p = pp["w1"].shape
    oupt_p = pp["w4"].shape[1]

    # Batch tile: large enough to amortize per-grid-step overhead; keep the
    # grid length >= 2 when the batch allows it (v7x megacore sharding).
    if tb is None:
        if B >= 512:
            tb = 256
        elif B >= 16:
            tb = _round_up(_round_up(B, 16) // 2, 8)
        else:
            tb = 8
    B_p = _round_up(B, tb)          # pad the batch instead of asserting
    grid = (B_p // tb,)

    # Pad + cast activations once in the wrapper; padded rows/cols are zeros
    # (zero weight rows make them inert) and are sliced off after the call.
    x_p = jnp.zeros((B_p, inpt_p), jnp.bfloat16).at[:B, :inpt].set(
        x.astype(jnp.bfloat16))

    full = lambda shape: pl.BlockSpec(shape, lambda i: (0, 0))

    flops = 2 * B_p * (inpt_p * hidn_p + 2 * hidn_p * hidn_p + hidn_p * oupt_p)
    weight_bytes = sum(int(v.size) * v.dtype.itemsize for v in pp.values())
    bytes_accessed = B_p * inpt_p * 2 + B_p * oupt_p * 4 + weight_bytes

    out = pl.pallas_call(
        mlp_kernel,
        out_shape=jax.ShapeDtypeStruct((B_p, oupt_p), jnp.float32),
        grid_spec=pl.GridSpec(
            grid=grid,
            in_specs=[
                pl.BlockSpec((tb, inpt_p), lambda i: (i, 0)),   # x tile
                full((inpt_p, hidn_p)), full((1, hidn_p)),      # l1
                full((hidn_p, hidn_p)), full((1, hidn_p)),      # l2
                full((hidn_p, hidn_p)), full((1, hidn_p)),      # l3
                full((hidn_p, oupt_p)), full((1, oupt_p)),      # l4
            ],
            out_specs=pl.BlockSpec((tb, oupt_p), lambda i: (i, 0)),
        ),
        compiler_params=pltpu.CompilerParams(
            dimension_semantics=("parallel",)),
        cost_estimate=pl.CostEstimate(
            flops=flops, transcendentals=0, bytes_accessed=bytes_accessed),
    )(x_p, pp["w1"], pp["b1"], pp["w2"], pp["b2"],
      pp["w3"], pp["b3"], pp["w4"], pp["b4"])

    return out[:B, :oupt]


def init_linear(key, fan_in, fan_out):
    """PyTorch-style Linear init: U(-1/sqrt(fan_in), 1/sqrt(fan_in)).
    Weight returned as (fan_in, fan_out) (transposed vs. torch), bias (1, fan_out)."""
    kw, kb = jax.random.split(key)
    bound = 1.0 / jnp.sqrt(fan_in)
    w = jax.random.uniform(kw, (fan_in, fan_out), jnp.float32, -bound, bound)
    b = jax.random.uniform(kb, (1, fan_out), jnp.float32, -bound, bound)
    return w, b


def reference_forward(x, params):
    """Pure-JAX reference with the same numerics as the kernel:
    bf16 inputs/weights on the MXU, f32 accumulate, f32 bias/ReLU."""
    bf = lambda a: a.astype(jnp.bfloat16)
    dot = lambda a, b: jnp.dot(bf(a), bf(b), preferred_element_type=jnp.float32)
    h = jnp.maximum(dot(x, params["w1"]) + params["b1"], 0.0)
    h = jnp.maximum(dot(h, params["w2"]) + params["b2"], 0.0)
    h = jnp.maximum(dot(h, params["w3"]) + params["b3"], 0.0)  # dropout = identity (eval)
    return dot(h, params["w4"]) + params["b4"]


if __name__ == "__main__":
    # Small shapes consistent with the module: batch=8, inpt=32, hidn=64, oupt=16
    B, INPT, HIDN, OUPT = 8, 32, 64, 16

    root = jax.random.PRNGKey(0)
    kx, k1, k2, k3, k4 = jax.random.split(root, 5)

    x = jax.random.normal(kx, (B, INPT), jnp.float32)

    w1, b1 = init_linear(k1, INPT, HIDN)
    w2, b2 = init_linear(k2, HIDN, HIDN)
    w3, b3 = init_linear(k3, HIDN, HIDN)
    w4, b4 = init_linear(k4, HIDN, OUPT)
    params = dict(w1=w1, b1=b1, w2=w2, b2=b2, w3=w3, b3=b3, w4=w4, b4=b4)

    out = neural_net_forward(x, params)
    out = jax.block_until_ready(out)

    ref = reference_forward(x, params)
    assert out.shape == (B, OUPT)
    assert jnp.allclose(out, ref, atol=2e-3, rtol=2e-3), "mismatch vs. JAX reference"

    print("KERNEL_OK")
</pallas_src>

<mosaic_0001>
module attributes {stable_mosaic.version = 11 : i64} {
  func.func @mlp_kernel(%arg0: i32, %arg1: memref<8x128xbf16, #tpu.memory_space<vmem>>, %arg2: memref<128x128xbf16, #tpu.memory_space<vmem>>, %arg3: memref<1x128xf32, #tpu.memory_space<vmem>>, %arg4: memref<128x128xbf16, #tpu.memory_space<vmem>>, %arg5: memref<1x128xf32, #tpu.memory_space<vmem>>, %arg6: memref<128x128xbf16, #tpu.memory_space<vmem>>, %arg7: memref<1x128xf32, #tpu.memory_space<vmem>>, %arg8: memref<128x128xbf16, #tpu.memory_space<vmem>>, %arg9: memref<1x128xf32, #tpu.memory_space<vmem>>, %arg10: memref<8x128xf32, #tpu.memory_space<vmem>>) attributes {dimension_semantics = [#tpu.dimension_semantics<parallel>], iteration_bounds = array<i64: 1>, scalar_prefetch = 0 : i64, scratch_operands = 0 : i64, tpu.core_type = #tpu.core_type<tc>, window_params = [{transform_indices = @transform_0, window_bounds = array<i64: 8, 128>}, {pipeline_mode = #tpu.pipeline_mode<synchronous>, transform_indices = @transform_1, window_bounds = array<i64: 128, 128>}, {pipeline_mode = #tpu.pipeline_mode<synchronous>, transform_indices = @transform_2, window_bounds = array<i64: 1, 128>}, {pipeline_mode = #tpu.pipeline_mode<synchronous>, transform_indices = @transform_3, window_bounds = array<i64: 128, 128>}, {pipeline_mode = #tpu.pipeline_mode<synchronous>, transform_indices = @transform_4, window_bounds = array<i64: 1, 128>}, {pipeline_mode = #tpu.pipeline_mode<synchronous>, transform_indices = @transform_5, window_bounds = array<i64: 128, 128>}, {pipeline_mode = #tpu.pipeline_mode<synchronous>, transform_indices = @transform_6, window_bounds = array<i64: 1, 128>}, {pipeline_mode = #tpu.pipeline_mode<synchronous>, transform_indices = @transform_7, window_bounds = array<i64: 128, 128>}, {pipeline_mode = #tpu.pipeline_mode<synchronous>, transform_indices = @transform_8, window_bounds = array<i64: 1, 128>}, {transform_indices = @transform_9, window_bounds = array<i64: 8, 128>}]} {
    %c0 = arith.constant 0 : index
    %c0_0 = arith.constant 0 : index
    %0 = vector.load %arg1[%c0, %c0_0] : memref<8x128xbf16, #tpu.memory_space<vmem>>, vector<8x128xbf16>
    %c0_1 = arith.constant 0 : index
    %c0_2 = arith.constant 0 : index
    %1 = vector.load %arg2[%c0_1, %c0_2] : memref<128x128xbf16, #tpu.memory_space<vmem>>, vector<128x128xbf16>
    %cst = arith.constant dense<0.000000e+00> : vector<8x128xf32>
    %2 = tpu.matmul %0, %1, %cst {dimension_numbers = #tpu.dot_dimension_numbers<[1], [0], [0], [1], [0, 0, 1, 1], [], []>} : vector<8x128xbf16>, vector<128x128xbf16>, vector<8x128xf32> -> vector<8x128xf32>
    %c0_3 = arith.constant 0 : index
    %c0_4 = arith.constant 0 : index
    %3 = vector.load %arg3[%c0_3, %c0_4] : memref<1x128xf32, #tpu.memory_space<vmem>>, vector<1x128xf32>
    %4 = vector.broadcast %3 : vector<1x128xf32> to vector<8x128xf32>
    %5 = arith.addf %2, %4 : vector<8x128xf32>
    %cst_5 = arith.constant 0.000000e+00 : f32
    %6 = vector.broadcast %cst_5 : f32 to vector<8x128xf32>
    %7 = arith.maximumf %5, %6 : vector<8x128xf32>
    %8 = arith.truncf %7 : vector<8x128xf32> to vector<8x128xbf16>
    %c0_6 = arith.constant 0 : index
    %c0_7 = arith.constant 0 : index
    %9 = vector.load %arg4[%c0_6, %c0_7] : memref<128x128xbf16, #tpu.memory_space<vmem>>, vector<128x128xbf16>
    %cst_8 = arith.constant dense<0.000000e+00> : vector<8x128xf32>
    %10 = tpu.matmul %8, %9, %cst_8 {dimension_numbers = #tpu.dot_dimension_numbers<[1], [0], [0], [1], [0, 0, 1, 1], [], []>} : vector<8x128xbf16>, vector<128x128xbf16>, vector<8x128xf32> -> vector<8x128xf32>
    %c0_9 = arith.constant 0 : index
    %c0_10 = arith.constant 0 : index
    %11 = vector.load %arg5[%c0_9, %c0_10] : memref<1x128xf32, #tpu.memory_space<vmem>>, vector<1x128xf32>
    %12 = vector.broadcast %11 : vector<1x128xf32> to vector<8x128xf32>
    %13 = arith.addf %10, %12 : vector<8x128xf32>
    %cst_11 = arith.constant 0.000000e+00 : f32
    %14 = vector.broadcast %cst_11 : f32 to vector<8x128xf32>
    %15 = arith.maximumf %13, %14 : vector<8x128xf32>
    %16 = arith.truncf %15 : vector<8x128xf32> to vector<8x128xbf16>
    %c0_12 = arith.constant 0 : index
    %c0_13 = arith.constant 0 : index
    %17 = vector.load %arg6[%c0_12, %c0_13] : memref<128x128xbf16, #tpu.memory_space<vmem>>, vector<128x128xbf16>
    %cst_14 = arith.constant dense<0.000000e+00> : vector<8x128xf32>
    %18 = tpu.matmul %16, %17, %cst_14 {dimension_numbers = #tpu.dot_dimension_numbers<[1], [0], [0], [1], [0, 0, 1, 1], [], []>} : vector<8x128xbf16>, vector<128x128xbf16>, vector<8x128xf32> -> vector<8x128xf32>
    %c0_15 = arith.constant 0 : index
    %c0_16 = arith.constant 0 : index
    %19 = vector.load %arg7[%c0_15, %c0_16] : memref<1x128xf32, #tpu.memory_space<vmem>>, vector<1x128xf32>
    %20 = vector.broadcast %19 : vector<1x128xf32> to vector<8x128xf32>
    %21 = arith.addf %18, %20 : vector<8x128xf32>
    %cst_17 = arith.constant 0.000000e+00 : f32
    %22 = vector.broadcast %cst_17 : f32 to vector<8x128xf32>
    %23 = arith.maximumf %21, %22 : vector<8x128xf32>
    %24 = arith.truncf %23 : vector<8x128xf32> to vector<8x128xbf16>
    %c0_18 = arith.constant 0 : index
    %c0_19 = arith.constant 0 : index
    %25 = vector.load %arg8[%c0_18, %c0_19] : memref<128x128xbf16, #tpu.memory_space<vmem>>, vector<128x128xbf16>
    %cst_20 = arith.constant dense<0.000000e+00> : vector<8x128xf32>
    %26 = tpu.matmul %24, %25, %cst_20 {dimension_numbers = #tpu.dot_dimension_numbers<[1], [0], [0], [1], [0, 0, 1, 1], [], []>} : vector<8x128xbf16>, vector<128x128xbf16>, vector<8x128xf32> -> vector<8x128xf32>
    %c0_21 = arith.constant 0 : index
    %c0_22 = arith.constant 0 : index
    %27 = vector.load %arg9[%c0_21, %c0_22] : memref<1x128xf32, #tpu.memory_space<vmem>>, vector<1x128xf32>
    %28 = vector.broadcast %27 : vector<1x128xf32> to vector<8x128xf32>
    %29 = arith.addf %26, %28 : vector<8x128xf32>
    %c0_23 = arith.constant 0 : index
    %c0_24 = arith.constant 0 : index
    %30 = vector.load %arg10[%c0_23, %c0_24] : memref<8x128xf32, #tpu.memory_space<vmem>>, vector<8x128xf32>
    tpu.vector_store %arg10[%c0_23, %c0_24], %29 {strides = array<i32>} : memref<8x128xf32, #tpu.memory_space<vmem>>, vector<8x128xf32>,
    return
  }
  func.func @transform_0(%arg0: i32) -> (i32, i32) {
    %c0_i32 = arith.constant 0 : i32
    %c0_i32_0 = arith.constant 0 : i32
    return %arg0, %c0_i32 : i32, i32
  }
  func.func @transform_1(%arg0: i32) -> (i32, i32) {
    %c0_i32 = arith.constant 0 : i32
    %c0_i32_0 = arith.constant 0 : i32
    %c0_i32_1 = arith.constant 0 : i32
    return %c0_i32, %c0_i32_0 : i32, i32
  }
  func.func @transform_2(%arg0: i32) -> (i32, i32) {
    %c0_i32 = arith.constant 0 : i32
    %c0_i32_0 = arith.constant 0 : i32
    %c0_i32_1 = arith.constant 0 : i32
    return %c0_i32, %c0_i32_0 : i32, i32
  }
  func.func @transform_3(%arg0: i32) -> (i32, i32) {
    %c0_i32 = arith.constant 0 : i32
    %c0_i32_0 = arith.constant 0 : i32
    %c0_i32_1 = arith.constant 0 : i32
    return %c0_i32, %c0_i32_0 : i32, i32
  }
  func.func @transform_4(%arg0: i32) -> (i32, i32) {
    %c0_i32 = arith.constant 0 : i32
    %c0_i32_0 = arith.constant 0 : i32
    %c0_i32_1 = arith.constant 0 : i32
    return %c0_i32, %c0_i32_0 : i32, i32
  }
  func.func @transform_5(%arg0: i32) -> (i32, i32) {
    %c0_i32 = arith.constant 0 : i32
    %c0_i32_0 = arith.constant 0 : i32
    %c0_i32_1 = arith.constant 0 : i32
    return %c0_i32, %c0_i32_0 : i32, i32
  }
  func.func @transform_6(%arg0: i32) -> (i32, i32) {
    %c0_i32 = arith.constant 0 : i32
    %c0_i32_0 = arith.constant 0 : i32
    %c0_i32_1 = arith.constant 0 : i32
    return %c0_i32, %c0_i32_0 : i32, i32
  }
  func.func @transform_7(%arg0: i32) -> (i32, i32) {
    %c0_i32 = arith.constant 0 : i32
    %c0_i32_0 = arith.constant 0 : i32
    %c0_i32_1 = arith.constant 0 : i32
    return %c0_i32, %c0_i32_0 : i32, i32
  }
  func.func @transform_8(%arg0: i32) -> (i32, i32) {
    %c0_i32 = arith.constant 0 : i32
    %c0_i32_0 = arith.constant 0 : i32
    %c0_i32_1 = arith.constant 0 : i32
    return %c0_i32, %c0_i32_0 : i32, i32
  }
  func.func @transform_9(%arg0: i32) -> (i32, i32) {
    %c0_i32 = arith.constant 0 : i32
    %c0_i32_0 = arith.constant 0 : i32
    return %arg0, %c0_i32 : i32, i32
  }
}

</mosaic_0001>

<bundles_post_ra>
// kernel: tpu_custom_call.1
= control target key start
LH: loop header
LB: loop body
LE: loop exit
PB: predicated region body
PF: predicated region fallthrough
CT: control target
= control target key end

     0   :  { %14 = vsyncpa [#allocation3], 0  ;;  %s1099_s0 = inlined_call_operand.hbm [shape: bf16[8,128], index: 0, kind: input, shape index: {}]   ;;  %s1100_s1 = inlined_call_operand.hbm [shape: bf16[128,128], index: 1, kind: input, shape index: {}]   ;;  %s1101_s2 = inlined_call_operand.vmem [shape: f32[1,128], index: 2, kind: input, shape index: {}]   ;;  %s1102_s3 = inlined_call_operand.hbm [shape: bf16[128,128], index: 3, kind: input, shape index: {}]   ;;  %s1103_s4 = inlined_call_operand.vmem [shape: f32[1,128], index: 4, kind: input, shape index: {}]   ;;  %s1104_s5 = inlined_call_operand.hbm [shape: bf16[128,128], index: 5, kind: input, shape index: {}]   ;;  %s1105_s6 = inlined_call_operand.vmem [shape: f32[1,128], index: 6, kind: input, shape index: {}]   ;;  %s1106_s7 = inlined_call_operand.hbm [shape: bf16[128,128], index: 7, kind: input, shape index: {}]   ;;  %s1107_s8 = inlined_call_operand.vmem [shape: f32[1,128], index: 8, kind: input, shape index: {}]   ;;  %s1108_s9 = inlined_call_operand.hbm [shape: f32[8,128], index: 9, kind: output, shape index: {}]  }
   0x1   :  { %15 = vsyncpa [#allocation6], 0 }
   0x2   :  { %16 = vsyncpa [#allocation9], 0 }
   0x3   :  { %17 = vsyncpa [#allocation4], 0  ;;  %s903_s30 = smov [#allocation5]   ;;  %s763_s13 = scalar_lea.hbm %s1100_s1, 1024 }
   0x4   :  { %s33_s10 = sshll.u32 %s903_s30, 4  ;;  %p764_p0 = scmp.ne.s32.totalorder %s1100_s1, %s763_s13  ;;  %s34_s10 = int_to_ptr.vmem [resolvable:$true] %s33_s10 }
   0x5   :  { %p767_p1 = scmp.lt.u32.totalorder %s763_s13, %s1100_s1 }
   0x7   :  { %p769_p2 = pnand %p767_p1, %p764_p0 }
   0x9   :  { %772 = shalt.err (!%p769_p2)
}
   0xa   :  { %s773_s18 = scalar_lea.vmem %s34_s10, 1024  ;;  %p778_p4 = scmp.lt.s32.totalorder %s34_s10, %s34_s10 }
   0xb   :  { %p774_p3 = scmp.ne.s32.totalorder %s34_s10, %s773_s18  ;;  %p779_p5 = scmp.lt.s32.totalorder %s773_s18, %s773_s18 }
   0xd   :  { %p780_p6 = por %p779_p5, %p778_p4 }
   0xf   :  { %p781_p7 = pnand %p780_p6, %p774_p3 }
  0x11   :  { %784 = shalt.err (!%p781_p7)
}
  0x12   :  { %s904_s19 = smov 64   ;;  %s905_s20 = smov 4  }
  0x13   :  { %39 = dma.hbm_to_vmem [thread:$0]  %s1100_s1, 1024, %s34_s10, [#allocation6], %s904_s19, %s904_s19, %s905_s20  }
  0x14   :  { %s906_s23 = smov [#allocation8]   ;;  %s907_s25 = smov [#allocation2]  }
  0x15   :  { %s61_s24 = sshll.u32 %s906_s23, 4  ;;  %s24_s26 = sshll.u32 %s907_s25, 4  ;;  %s62_s24 = int_to_ptr.vmem [resolvable:$true] %s61_s24  ;;  %s25_s26 = int_to_ptr.vmem [resolvable:$true] %s24_s26 }
  0x16   :  { %s785_s29 = scalar_lea.hbm %s1104_s5, 1024 }
  0x17   :  { %p786_p8 = scmp.ne.s32.totalorder %s1104_s5, %s785_s29  ;;  %p789_p9 = scmp.lt.u32.totalorder %s785_s29, %s1104_s5 }
  0x19   :  { %p791_p10 = pnand %p789_p9, %p786_p8 }
  0x1b   :  { %794 = shalt.err (!%p791_p10)
}
  0x1c   :  { %s795_s1 = scalar_lea.vmem %s62_s24, 1024  ;;  %p800_p12 = scmp.lt.s32.totalorder %s62_s24, %s62_s24 }
  0x1d   :  { %p796_p11 = scmp.ne.s32.totalorder %s62_s24, %s795_s1  ;;  %p801_p13 = scmp.lt.s32.totalorder %s795_s1, %s795_s1 }
  0x1f   :  { %p802_p0 = por %p801_p13, %p800_p12 }
  0x21   :  { %p803_p1 = pnand %p802_p0, %p796_p11 }
  0x23   :  { %806 = shalt.err (!%p803_p1)
}
  0x24   :  { %67 = dma.hbm_to_vmem [thread:$0]  %s1104_s5, 1024, %s62_s24, [#allocation9], %s904_s19, %s904_s19, %s905_s20  }
  0x25   :  { %s807_s17 = scalar_lea.hbm %s1099_s0, 64 }
  0x26   :  { %p808_p2 = scmp.ne.s32.totalorder %s1099_s0, %s807_s17  ;;  %p811_p3 = scmp.lt.u32.totalorder %s807_s17, %s1099_s0 }
  0x28   :  { %p813_p4 = pnand %p811_p3, %p808_p2 }
  0x2a   :  { %816 = shalt.err (!%p813_p4)
}
  0x2b   :  { %s817_s25 = scalar_lea.vmem %s25_s26, 64  ;;  %p822_p6 = scmp.lt.s32.totalorder %s25_s26, %s25_s26 }
  0x2c   :  { %p818_p5 = scmp.ne.s32.totalorder %s25_s26, %s817_s25  ;;  %p823_p7 = scmp.lt.s32.totalorder %s817_s25, %s817_s25 }
  0x2e   :  { %p824_p8 = por %p823_p7, %p822_p6 }
  0x30   :  { %p825_p9 = pnand %p824_p8, %p818_p5 }
  0x32   :  { %828 = shalt.err (!%p825_p9)
}
  0x33   :  { %27 = dma.hbm_to_vmem [thread:$0]  %s1099_s0, 64, %s25_s26, [#allocation3]  }
  0x34   :  { %s908_s27 = smov [#allocation7]   ;;  %s909_s29 = smov [#allocation10]  }
  0x35   :  { %s47_s28 = sshll.u32 %s908_s27, 4  ;;  %s75_s30 = sshll.u32 %s909_s29, 4  ;;  %s48_s28 = int_to_ptr.vmem [resolvable:$true] %s47_s28  ;;  %s76_s30 = int_to_ptr.vmem [resolvable:$true] %s75_s30 }
  0x36   :  { %s829_s13 = scalar_lea.hbm %s1102_s3, 1024 }
  0x37   :  { %p830_p10 = scmp.ne.s32.totalorder %s1102_s3, %s829_s13  ;;  %p833_p11 = scmp.lt.u32.totalorder %s829_s13, %s1102_s3 }
  0x39   :  { %p835_p12 = pnand %p833_p11, %p830_p10 }
  0x3b   :  { %838 = shalt.err (!%p835_p12)
}
  0x3c   :  { %s839_s0 = scalar_lea.vmem %s48_s28, 1024  ;;  %p844_p0 = scmp.lt.s32.totalorder %s48_s28, %s48_s28 }
  0x3d   :  { %p840_p13 = scmp.ne.s32.totalorder %s48_s28, %s839_s0  ;;  %p845_p1 = scmp.lt.s32.totalorder %s839_s0, %s839_s0 }
  0x3f   :  { %p846_p2 = por %p845_p1, %p844_p0 }
  0x41   :  { %p847_p3 = pnand %p846_p2, %p840_p13 }
  0x43   :  { %850 = shalt.err (!%p847_p3)
}
  0x44   :  { %53 = dma.hbm_to_vmem [thread:$0]  %s1102_s3, 1024, %s48_s28, [#allocation6], %s904_s19, %s904_s19, %s905_s20  }
  0x45   :  { %s851_s21 = scalar_lea.hbm %s1106_s7, 1024 }
  0x46   :  { %p852_p4 = scmp.ne.s32.totalorder %s1106_s7, %s851_s21  ;;  %p855_p5 = scmp.lt.u32.totalorder %s851_s21, %s1106_s7 }
  0x48   :  { %p857_p6 = pnand %p855_p5, %p852_p4 }
  0x4a   :  { %860 = shalt.err (!%p857_p6)
}
  0x4b   :  { %s861_s24 = scalar_lea.vmem %s76_s30, 1024  ;;  %p866_p8 = scmp.lt.s32.totalorder %s76_s30, %s76_s30 }
  0x4c   :  { %p862_p7 = scmp.ne.s32.totalorder %s76_s30, %s861_s24  ;;  %p867_p9 = scmp.lt.s32.totalorder %s861_s24, %s861_s24 }
  0x4e   :  { %p868_p10 = por %p867_p9, %p866_p8 }
  0x50   :  { %p869_p11 = pnand %p868_p10, %p862_p7 }
  0x52   :  { %872 = shalt.err (!%p869_p11)
}
  0x53   :  { %81 = dma.hbm_to_vmem [thread:$0]  %s1106_s7, 1024, %s76_s30, [#allocation9], %s904_s19, %s904_s19, %s905_s20  }
  0x54   :  { %895 = dma.done.wait [#allocation3], 64  }
  0x55   :  { %896 = vsyncadd [#allocation3], 4294967232 }
  0x56   :  { %897 = dma.done.wait [#allocation6], 2048  }
  0x57   :  { %898 = vsyncadd [#allocation6], 4294965248 }
  0x58   :  { %899 = dma.done.wait [#allocation9], 2048  }
  0x59   :  { %900 = vsyncadd [#allocation9], 4294965248  ;;  %v910_v0 = vmov 0.0   ;;  %vm911_vm0 = vmmov 0   ;;  %v731_v1 = vld [vmem:[#allocation5] sm:$0xff]   ;;  %v732_v2 = vld [vmem:[#allocation5 + $0x8] sm:$0xff]  }
  0x5a   :  { %641 = vmatprep.subr.bf16.mxu0 %v910_v0  ;;  %657 = vmatprep.mubr.msk.bf16.mxu0 %vm911_vm0, %v910_v0  ;;  %v733_v3 = vld [vmem:[#allocation5 + $0x10] sm:$0xff]   ;;  %v739_v4 = vld [vmem:[#allocation7] sm:$0xff]   ;;  %v734_v5 = vld [vmem:[#allocation5 + $0x18] sm:$0xff]   ;;  %s912_s11 = smov [#allocation11]  }
  0x5b   :  { %661 = vmatprep.subr.bf16.mxu1 %v910_v0  ;;  %677 = vmatprep.mubr.msk.bf16.mxu1 %vm911_vm0, %v910_v0  ;;  %v740_v6 = vld [vmem:[#allocation7 + $0x8] sm:$0xff]   ;;  %v735_v7 = vld [vmem:[#allocation5 + $0x20] sm:$0xff]   ;;  %v741_v8 = vld [vmem:[#allocation7 + $0x10] sm:$0xff]   ;;  %s558_s12 = sshll.u32 %s912_s11, 4  ;;  %s559_s12 = int_to_ptr.vmem [resolvable:$true] %s558_s12 }
  0x5c   :  { %642 = vmatpush3.bf16.msra.mxu0 %v731_v1  ;;  %662 = vmatpush3.bf16.msra.mxu1 %v739_v4  ;;  %v736_v9 = vld [vmem:[#allocation5 + $0x28] sm:$0xff]   ;;  %v742_v10 = vld [vmem:[#allocation7 + $0x18] sm:$0xff]   ;;  %v737_v11 = vld [vmem:[#allocation5 + $0x30] sm:$0xff]   ;;  %p878_p13 = scmp.lt.s32.totalorder %s559_s12, %s559_s12 }
  0x5d   :  { %643 = vmatprep.subr.bf16.mxu0 %v910_v0  ;;  %663 = vmatprep.subr.bf16.mxu1 %v910_v0  ;;  %v743_v12 = vld [vmem:[#allocation7 + $0x20] sm:$0xff]   ;;  %v738_v13 = vld [vmem:[#allocation5 + $0x38] sm:$0xff]   ;;  %v744_v14 = vld [vmem:[#allocation7 + $0x28] sm:$0xff]  }
  0x5e   :  { %v100_v15 = vld [vmem:[#allocation2] sm:$0xf]  ;;  %v745_v16 = vld [vmem:[#allocation7 + $0x30] sm:$0xff]   ;;  %v747_v18 = vld [vmem:[#allocation8] sm:$0xff]  }
  0x5f   :  { %v746_v17 = vld [vmem:[#allocation7 + $0x38] sm:$0xff]   ;;  %v748_v19 = vld [vmem:[#allocation8 + $0x8] sm:$0xff]   ;;  %v749_v20 = vld [vmem:[#allocation8 + $0x10] sm:$0xff]  }
  0x60   :  { %644 = vmatpush3.bf16.msra.mxu0 %v732_v2  ;;  %664 = vmatpush3.bf16.msra.mxu1 %v740_v6  ;;  %v750_v21 = vld [vmem:[#allocation8 + $0x18] sm:$0xff]   ;;  %v751_v22 = vld [vmem:[#allocation8 + $0x20] sm:$0xff]   ;;  %v752_v23 = vld [vmem:[#allocation8 + $0x28] sm:$0xff]  }
  0x61   :  { %645 = vmatprep.subr.bf16.mxu0 %v910_v0  ;;  %665 = vmatprep.subr.bf16.mxu1 %v910_v0  ;;  %v569_v24 = vld [vmem:[%s1101_s2] ss:$0 sm:$0xff]  ;;  %v753_v32 = vld [vmem:[#allocation8 + $0x30] sm:$0xff]   ;;  %v755_v34 = vld [vmem:[#allocation10] sm:$0xff]  }
  0x62   :  { %v754_v33 = vld [vmem:[#allocation8 + $0x38] sm:$0xff]   ;;  %v756_v35 = vld [vmem:[#allocation10 + $0x8] sm:$0xff]   ;;  %v757_v36 = vld [vmem:[#allocation10 + $0x10] sm:$0xff]  }
  0x63   :  { %v758_v37 = vld [vmem:[#allocation10 + $0x18] sm:$0xff]   ;;  %v759_v38 = vld [vmem:[#allocation10 + $0x20] sm:$0xff]   ;;  %v760_v39 = vld [vmem:[#allocation10 + $0x28] sm:$0xff]  }
  0x64   :  { %646 = vmatpush3.bf16.msra.mxu0 %v733_v3  ;;  %666 = vmatpush3.bf16.msra.mxu1 %v741_v8  ;;  %v578_v40 = vld [vmem:[%s1103_s4] ss:$0 sm:$0xff]  ;;  %v761_v48 = vld [vmem:[#allocation10 + $0x30] sm:$0xff]  }
  0x65   :  { %647 = vmatprep.subr.bf16.mxu0 %v910_v0  ;;  %667 = vmatprep.subr.bf16.mxu1 %v910_v0  ;;  %v762_v49 = vld [vmem:[#allocation10 + $0x38] sm:$0xff]  }
  0x66   :  { %v587_v50 = vld [vmem:[%s1105_s6] ss:$0 sm:$0xff]  ;;  %s873_s6 = scalar_lea.vmem %s559_s12, 128 }
  0x67   :  { %v596_v58 = vld [vmem:[%s1107_s8] ss:$0 sm:$0xff]  ;;  %p874_p12 = scmp.ne.s32.totalorder %s559_s12, %s873_s6  ;;  %p879_p0 = scmp.lt.s32.totalorder %s873_s6, %s873_s6 }
  0x68   :  { %648 = vmatpush3.bf16.msra.mxu0 %v734_v5  ;;  %668 = vmatpush3.bf16.msra.mxu1 %v742_v10 }
  0x69   :  { %649 = vmatprep.subr.bf16.mxu0 %v910_v0  ;;  %669 = vmatprep.subr.bf16.mxu1 %v910_v0  ;;  %p880_p1 = por %p879_p0, %p878_p13 }
  0x6b   :  { %p881_p2 = pnand %p880_p1, %p874_p12 }
  0x6c   :  { %650 = vmatpush3.bf16.msra.mxu0 %v735_v7  ;;  %670 = vmatpush3.bf16.msra.mxu1 %v743_v12 }
  0x6d   :  { %651 = vmatprep.subr.bf16.mxu0 %v910_v0  ;;  %671 = vmatprep.subr.bf16.mxu1 %v910_v0 }
  0x70   :  { %652 = vmatpush3.bf16.msra.mxu0 %v736_v9  ;;  %672 = vmatpush3.bf16.msra.mxu1 %v744_v14 }
  0x71   :  { %653 = vmatprep.subr.bf16.mxu0 %v910_v0  ;;  %673 = vmatprep.subr.bf16.mxu1 %v910_v0 }
  0x74   :  { %654 = vmatpush3.bf16.msra.mxu0 %v737_v11  ;;  %674 = vmatpush3.bf16.msra.mxu1 %v745_v16 }
  0x75   :  { %655 = vmatprep.subr.bf16.mxu0 %v910_v0  ;;  %675 = vmatprep.subr.bf16.mxu1 %v910_v0 }
  0x78   :  { %656 = vmatpush3.bf16.msra.mxu0 %v738_v13  ;;  %676 = vmatpush3.bf16.msra.mxu1 %v746_v17 }
  0x79   :  { %681 = vmatprep.subr.bf16.mxu0 %v910_v0  ;;  %701 = vmatprep.subr.bf16.mxu1 %v910_v0 }
  0x7b   :  { %658 = vmatmul.mubr.bf16.vlgmr.msra.gmra.mrb[0].mxu0 %v100_v15 }
  0x7c   :  { %697 = vmatprep.mubr.msk.bf16.mxu0 %vm911_vm0, %v910_v0  ;;  %682 = vmatpush3.bf16.msra.mxu0 %v747_v18 }
  0x7d   :  { %683 = vmatprep.subr.bf16.mxu0 %v910_v0 }
  0x80   :  { %684 = vmatpush3.bf16.msra.mxu0 %v748_v19 }
  0x81   :  { %685 = vmatprep.subr.bf16.mxu0 %v910_v0 }
  0x84   :  { %686 = vmatpush3.bf16.msra.mxu0 %v749_v20 }
  0x85   :  { %687 = vmatprep.subr.bf16.mxu0 %v910_v0 }
  0x88   :  { %688 = vmatpush3.bf16.msra.mxu0 %v750_v21 }
  0x89   :  { %689 = vmatprep.subr.bf16.mxu0 %v910_v0 }
  0x8c   :  { %690 = vmatpush3.bf16.msra.mxu0 %v751_v22 }
  0x8d   :  { %691 = vmatprep.subr.bf16.mxu0 %v910_v0 }
  0x90   :  { %692 = vmatpush3.bf16.msra.mxu0 %v752_v23 }
  0x91   :  { %693 = vmatprep.subr.bf16.mxu0 %v910_v0 }
  0x94   :  { %694 = vmatpush3.bf16.msra.mxu0 %v753_v32 }
  0x95   :  { %695 = vmatprep.subr.bf16.mxu0 %v910_v0 }
  0x98   :  { %696 = vmatpush3.bf16.msra.mxu0 %v754_v33 }
 0x14e   :  { %v206_v25 = vpop.f32.mrb[0].mxu0 }
 0x14f   :  { %v207_v26 = vadd.f32 %v569_v24, %v206_v25  ;;  %v659_v27 = vpop.f32.mrb[1].mxu0 }
 0x150   :  { %v209_v28 = vpop.f32.mrb[2].mxu0 }
 0x151   :  { %v212_v29 = vmax.f32 %v207_v26, 0.0  ;;  %v660_v30 = vpop.f32.mrb[3].mxu0 }
 0x153   :  { %v213_v31 = vpack.c.bf16 %v212_v29, %v212_v29 }
 0x155   :  { %678 = vmatmul.mubr.bf16.vlgmr.msra.gmra.mrb[0].mxu1 %v213_v31 }
 0x156   :  { %717 = vmatprep.mubr.msk.bf16.mxu1 %vm911_vm0, %v910_v0  ;;  %702 = vmatpush3.bf16.msra.mxu1 %v755_v34 }
 0x157   :  { %703 = vmatprep.subr.bf16.mxu1 %v910_v0 }
 0x15a   :  { %704 = vmatpush3.bf16.msra.mxu1 %v756_v35 }
 0x15b   :  { %705 = vmatprep.subr.bf16.mxu1 %v910_v0 }
 0x15e   :  { %706 = vmatpush3.bf16.msra.mxu1 %v757_v36 }
 0x15f   :  { %707 = vmatprep.subr.bf16.mxu1 %v910_v0 }
 0x162   :  { %708 = vmatpush3.bf16.msra.mxu1 %v758_v37 }
 0x163   :  { %709 = vmatprep.subr.bf16.mxu1 %v910_v0 }
 0x166   :  { %710 = vmatpush3.bf16.msra.mxu1 %v759_v38 }
 0x167   :  { %711 = vmatprep.subr.bf16.mxu1 %v910_v0 }
 0x16a   :  { %712 = vmatpush3.bf16.msra.mxu1 %v760_v39 }
 0x16b   :  { %713 = vmatprep.subr.bf16.mxu1 %v910_v0 }
 0x16e   :  { %714 = vmatpush3.bf16.msra.mxu1 %v761_v48 }
 0x16f   :  { %715 = vmatprep.subr.bf16.mxu1 %v910_v0 }
 0x172   :  { %716 = vmatpush3.bf16.msra.mxu1 %v762_v49 }
 0x228   :  { %v319_v41 = vpop.f32.mrb[0].mxu1 }
 0x229   :  { %v320_v42 = vadd.f32 %v578_v40, %v319_v41  ;;  %v679_v43 = vpop.f32.mrb[1].mxu1 }
 0x22a   :  { %v322_v44 = vpop.f32.mrb[2].mxu1 }
 0x22b   :  { %v325_v45 = vmax.f32 %v320_v42, 0.0  ;;  %v680_v46 = vpop.f32.mrb[3].mxu1 }
 0x22d   :  { %v326_v47 = vpack.c.bf16 %v325_v45, %v325_v45 }
 0x22f   :  { %698 = vmatmul.mubr.bf16.vlgmr.msra.gmra.mrb[4].mxu0 %v326_v47 }
 0x302   :  { %v432_v51 = vpop.f32.mrb[4].mxu0 }
 0x303   :  { %v433_v52 = vadd.f32 %v587_v50, %v432_v51  ;;  %v699_v53 = vpop.f32.mrb[5].mxu0 }
 0x304   :  { %v435_v54 = vpop.f32.mrb[6].mxu0 }
 0x305   :  { %v438_v55 = vmax.f32 %v433_v52, 0.0  ;;  %v700_v56 = vpop.f32.mrb[7].mxu0 }
 0x307   :  { %v439_v57 = vpack.c.bf16 %v438_v55, %v438_v55 }
 0x309   :  { %718 = vmatmul.mubr.bf16.vlgmr.msra.gmra.mrb[4].mxu1 %v439_v57 }
 0x3dc   :  { %v545_v59 = vpop.f32.mrb[4].mxu1 }
 0x3dd   :  { %v546_v60 = vadd.f32 %v596_v58, %v545_v59  ;;  %v719_v61 = vpop.f32.mrb[5].mxu1 }
 0x3de   :  { %v548_v62 = vpop.f32.mrb[6].mxu1 }
 0x3df   :  { %551 = vst [vmem:[#allocation11] sm:$0xff] %v546_v60  ;;  %v720_v63 = vpop.f32.mrb[7].mxu1 }
 0x3e0   :  { %884 = shalt.err (!%p881_p2)
}
 0x3e1   :  { %s885_s8 = scalar_lea.hbm %s1108_s9, 128 }
 0x3e2   :  { %p886_p3 = scmp.ne.s32.totalorder %s1108_s9, %s885_s8  ;;  %p889_p4 = scmp.lt.u32.totalorder %s885_s8, %s1108_s9 }
 0x3e4   :  { %p891_p5 = pnand %p889_p4, %p886_p3 }
 0x3e6   :  { %894 = shalt.err (!%p891_p5)
}
 0x3e7   :  { %561 = dma.vmem_to_hbm [thread:$0]  %s559_s12, 128, %s1108_s9, [#allocation4]  }
 0x3e8   :  { %901 = dma.done.wait [#allocation4], 128  }
 0x3e9   :  { %902 = vsyncadd [#allocation4], 4294967168 }
 0x3ea   :  { %565 = vsyncpa [#allocation3], 1 }
 0x3eb   :  { %566 = vsyncpa [#allocation6], 1 }
 0x3ec   :  { %567 = vsyncpa [#allocation9], 1 }
 0x3ed   :  { %568 = vsyncpa [#allocation4], 1 }

</bundles_post_ra>
